<compile_context>
chip_gen: v7x
topology: tpu7x:2x2x1
jax: 0.10.0
libtpu: 0.0.40
codegen_flags: <defaults>
</compile_context>

<pallas_src>
import jax
import jax.numpy as jnp
from jax.experimental import pallas as pl
from jax.experimental.pallas import tpu as pltpu

# TODO(synk): feature_extractor is an injected, undefined submodule in the
# original code; it is treated as identity here (input already (B, 1, 60, 80)).

IN_FEATURES = 60 * 80  # 4800

_CHUNK = 512    # lane chunk: multiple of 128 -> lane-aligned static slices
_ROW_GRP = 64   # row group:  multiple of 8  -> sublane-aligned static slices


def _dense_kernel(b_ref, x_ref, w_ref, o_ref):
    """out[r, 0] = sum_f x[r, f] * w[0, f] + bias  for one batch tile.

    b_ref: (1,)      bias, resident in SMEM
    x_ref: (TB, F)   flattened-input batch tile (VMEM)
    w_ref: (1, F)    lane-dense weight row (VMEM, same block every step)
    o_ref: (TB, 1)   output tile (VMEM)
    """
    tb, f = x_ref.shape
    rg = _ROW_GRP if tb % _ROW_GRP == 0 else tb   # row-group size
    n_rg = tb // rg
    n_ck = f // _CHUNK                             # 9 full 512-lane chunks
    rem = f - n_ck * _CHUNK                        # 192-lane tail

    bias = b_ref[0]

    # Static (fully unrolled) loops: equivalent to lax.fori_loop(unroll=True)
    # but every slice start is a compile-time constant and tile-aligned, so
    # each partial product ((rg, 512) = ~32 vregs) stays in registers.
    for g in range(n_rg):
        r0 = g * rg
        acc = jnp.zeros((rg, 1), jnp.float32)
        for c in range(n_ck):
            c0 = c * _CHUNK
            xg = x_ref[pl.ds(r0, rg), pl.ds(c0, _CHUNK)]
            wg = w_ref[:, pl.ds(c0, _CHUNK)]
            acc = acc + jnp.sum(xg * wg, axis=-1, keepdims=True)
        if rem:
            c0 = n_ck * _CHUNK
            xg = x_ref[pl.ds(r0, rg), pl.ds(c0, rem)]
            wg = w_ref[:, pl.ds(c0, rem)]
            acc = acc + jnp.sum(xg * wg, axis=-1, keepdims=True)
        o_ref[pl.ds(r0, rg), :] = (acc + bias).astype(o_ref.dtype)


def custom_regression_forward(x, weight, bias):
    """Forward pass of CustomRegressionModel.

    x:      (B, 1, 60, 80) float32  (feature_extractor == identity)
    weight: (1, 4800)      float32  (PyTorch nn.Linear layout: (out, in))
    bias:   (1,)           float32
    returns (B, 1)         float32
    """
    B = x.shape[0]
    # Flatten exactly like nn.Flatten (keep batch dim, row-major over C,H,W).
    x2d = x.reshape(B, -1).astype(jnp.float32)
    F = x2d.shape[1]
    assert F == IN_FEATURES

    w_row = weight.reshape(1, F).astype(jnp.float32)  # lane-dense weight row
    b1 = bias.reshape(1).astype(jnp.float32)          # scalar bias -> SMEM

    # Batch tiling.  No host padding of x: pl.cdiv grid + ragged last block.
    if B <= 256:
        TB = B          # single small tile
    elif B <= 512:
        TB = 256        # >= 2 grid steps -> shards across v7x's 2 TensorCores
    else:
        TB = 512        # ~9.8 MB tile; ~20 MB double-buffered (< 48 MiB limit)
    grid = (pl.cdiv(B, TB),)

    out = pl.pallas_call(
        _dense_kernel,
        out_shape=jax.ShapeDtypeStruct((B, 1), jnp.float32),
        grid_spec=pltpu.PrefetchScalarGridSpec(
            num_scalar_prefetch=0,
            grid=grid,
            in_specs=[
                # bias: whole (1,) array resident in SMEM, no per-step DMA
                pl.BlockSpec(memory_space=pltpu.MemorySpace.SMEM),
                # x: batch tile x full feature extent (4800 == full array dim)
                pl.BlockSpec((TB, F), lambda i: (i, 0)),
                # weight: single lane-dense row, same block every step
                pl.BlockSpec((1, F), lambda i: (0, 0)),
            ],
            out_specs=pl.BlockSpec((TB, 1), lambda i: (i, 0)),
        ),
        compiler_params=pltpu.CompilerParams(
            dimension_semantics=("parallel",),
            vmem_limit_bytes=48 << 20,
        ),
    )(b1, x2d, w_row)
    return out


if __name__ == "__main__":
    key = jax.random.PRNGKey(0)
    kx, kw, kb = jax.random.split(key, 3)

    B = 2
    # Input consistent with the module: flattens to 60*80 = 4800 features.
    x = jax.random.normal(kx, (B, 1, 60, 80), dtype=jnp.float32)

    # Deterministic Linear(4800, 1) params, PyTorch-style uniform(-1/sqrt(in), 1/sqrt(in)).
    bound = 1.0 / jnp.sqrt(jnp.float32(IN_FEATURES))
    weight = jax.random.uniform(
        kw, (1, IN_FEATURES), dtype=jnp.float32, minval=-bound, maxval=bound
    )
    bias = jax.random.uniform(
        kb, (1,), dtype=jnp.float32, minval=-bound, maxval=bound
    )

    out = custom_regression_forward(x, weight, bias)
    out = jax.block_until_ready(out)

    # Sanity check against plain-JAX reference.
    ref = x.reshape(B, -1) @ weight.T + bias
    assert out.shape == (B, 1)
    assert jnp.allclose(out, ref, atol=1e-4, rtol=1e-4)

    print("KERNEL_OK")
</pallas_src>

<mosaic_0001>
module attributes {stable_mosaic.version = 11 : i64} {
  func.func @_dense_kernel(%arg0: i32, %arg1: memref<1xf32, #tpu.memory_space<smem>>, %arg2: memref<2x4800xf32, #tpu.memory_space<vmem>>, %arg3: memref<1x4800xf32, #tpu.memory_space<vmem>>, %arg4: memref<2x1xf32, #tpu.memory_space<vmem>>) attributes {dimension_semantics = [#tpu.dimension_semantics<parallel>], iteration_bounds = array<i64: 1>, scalar_prefetch = 0 : i64, scratch_operands = 0 : i64, tpu.core_type = #tpu.core_type<tc>, window_params = [{transform_indices = @transform_0, window_bounds = array<i64: 1>}, {transform_indices = @transform_1, window_bounds = array<i64: 2, 4800>}, {pipeline_mode = #tpu.pipeline_mode<synchronous>, transform_indices = @transform_2, window_bounds = array<i64: 1, 4800>}, {transform_indices = @transform_3, window_bounds = array<i64: 2, 1>}]} {
    %c0 = arith.constant 0 : index
    %0 = memref.load %arg1[%c0] : memref<1xf32, #tpu.memory_space<smem>>
    %cst = arith.constant 0.000000e+00 : f32
    %1 = vector.broadcast %cst : f32 to vector<2x1xf32>
    %c0_0 = arith.constant 0 : index
    %c0_1 = arith.constant 0 : index
    %2 = vector.load %arg2[%c0_0, %c0_1] : memref<2x4800xf32, #tpu.memory_space<vmem>>, vector<2x512xf32>
    %c0_2 = arith.constant 0 : index
    %c0_3 = arith.constant 0 : index
    %3 = vector.load %arg3[%c0_2, %c0_3] : memref<1x4800xf32, #tpu.memory_space<vmem>>, vector<1x512xf32>
    %4 = vector.broadcast %3 : vector<1x512xf32> to vector<2x512xf32>
    %5 = arith.mulf %2, %4 : vector<2x512xf32>
    %cst_4 = arith.constant dense<0.000000e+00> : vector<2xf32>
    %6 = vector.multi_reduction <add>, %5, %cst_4 [1] : vector<2x512xf32> to vector<2xf32>
    %7 = vector.shape_cast %6 : vector<2xf32> to vector<2x1xf32>
    %8 = arith.addf %1, %7 : vector<2x1xf32>
    %c0_5 = arith.constant 0 : index
    %c512 = arith.constant 512 : index
    %9 = vector.load %arg2[%c0_5, %c512] : memref<2x4800xf32, #tpu.memory_space<vmem>>, vector<2x512xf32>
    %c0_6 = arith.constant 0 : index
    %c512_7 = arith.constant 512 : index
    %10 = vector.load %arg3[%c0_6, %c512_7] : memref<1x4800xf32, #tpu.memory_space<vmem>>, vector<1x512xf32>
    %11 = vector.broadcast %10 : vector<1x512xf32> to vector<2x512xf32>
    %12 = arith.mulf %9, %11 : vector<2x512xf32>
    %cst_8 = arith.constant dense<0.000000e+00> : vector<2xf32>
    %13 = vector.multi_reduction <add>, %12, %cst_8 [1] : vector<2x512xf32> to vector<2xf32>
    %14 = vector.shape_cast %13 : vector<2xf32> to vector<2x1xf32>
    %15 = arith.addf %8, %14 : vector<2x1xf32>
    %c0_9 = arith.constant 0 : index
    %c1024 = arith.constant 1024 : index
    %16 = vector.load %arg2[%c0_9, %c1024] : memref<2x4800xf32, #tpu.memory_space<vmem>>, vector<2x512xf32>
    %c0_10 = arith.constant 0 : index
    %c1024_11 = arith.constant 1024 : index
    %17 = vector.load %arg3[%c0_10, %c1024_11] : memref<1x4800xf32, #tpu.memory_space<vmem>>, vector<1x512xf32>
    %18 = vector.broadcast %17 : vector<1x512xf32> to vector<2x512xf32>
    %19 = arith.mulf %16, %18 : vector<2x512xf32>
    %cst_12 = arith.constant dense<0.000000e+00> : vector<2xf32>
    %20 = vector.multi_reduction <add>, %19, %cst_12 [1] : vector<2x512xf32> to vector<2xf32>
    %21 = vector.shape_cast %20 : vector<2xf32> to vector<2x1xf32>
    %22 = arith.addf %15, %21 : vector<2x1xf32>
    %c0_13 = arith.constant 0 : index
    %c1536 = arith.constant 1536 : index
    %23 = vector.load %arg2[%c0_13, %c1536] : memref<2x4800xf32, #tpu.memory_space<vmem>>, vector<2x512xf32>
    %c0_14 = arith.constant 0 : index
    %c1536_15 = arith.constant 1536 : index
    %24 = vector.load %arg3[%c0_14, %c1536_15] : memref<1x4800xf32, #tpu.memory_space<vmem>>, vector<1x512xf32>
    %25 = vector.broadcast %24 : vector<1x512xf32> to vector<2x512xf32>
    %26 = arith.mulf %23, %25 : vector<2x512xf32>
    %cst_16 = arith.constant dense<0.000000e+00> : vector<2xf32>
    %27 = vector.multi_reduction <add>, %26, %cst_16 [1] : vector<2x512xf32> to vector<2xf32>
    %28 = vector.shape_cast %27 : vector<2xf32> to vector<2x1xf32>
    %29 = arith.addf %22, %28 : vector<2x1xf32>
    %c0_17 = arith.constant 0 : index
    %c2048 = arith.constant 2048 : index
    %30 = vector.load %arg2[%c0_17, %c2048] : memref<2x4800xf32, #tpu.memory_space<vmem>>, vector<2x512xf32>
    %c0_18 = arith.constant 0 : index
    %c2048_19 = arith.constant 2048 : index
    %31 = vector.load %arg3[%c0_18, %c2048_19] : memref<1x4800xf32, #tpu.memory_space<vmem>>, vector<1x512xf32>
    %32 = vector.broadcast %31 : vector<1x512xf32> to vector<2x512xf32>
    %33 = arith.mulf %30, %32 : vector<2x512xf32>
    %cst_20 = arith.constant dense<0.000000e+00> : vector<2xf32>
    %34 = vector.multi_reduction <add>, %33, %cst_20 [1] : vector<2x512xf32> to vector<2xf32>
    %35 = vector.shape_cast %34 : vector<2xf32> to vector<2x1xf32>
    %36 = arith.addf %29, %35 : vector<2x1xf32>
    %c0_21 = arith.constant 0 : index
    %c2560 = arith.constant 2560 : index
    %37 = vector.load %arg2[%c0_21, %c2560] : memref<2x4800xf32, #tpu.memory_space<vmem>>, vector<2x512xf32>
    %c0_22 = arith.constant 0 : index
    %c2560_23 = arith.constant 2560 : index
    %38 = vector.load %arg3[%c0_22, %c2560_23] : memref<1x4800xf32, #tpu.memory_space<vmem>>, vector<1x512xf32>
    %39 = vector.broadcast %38 : vector<1x512xf32> to vector<2x512xf32>
    %40 = arith.mulf %37, %39 : vector<2x512xf32>
    %cst_24 = arith.constant dense<0.000000e+00> : vector<2xf32>
    %41 = vector.multi_reduction <add>, %40, %cst_24 [1] : vector<2x512xf32> to vector<2xf32>
    %42 = vector.shape_cast %41 : vector<2xf32> to vector<2x1xf32>
    %43 = arith.addf %36, %42 : vector<2x1xf32>
    %c0_25 = arith.constant 0 : index
    %c3072 = arith.constant 3072 : index
    %44 = vector.load %arg2[%c0_25, %c3072] : memref<2x4800xf32, #tpu.memory_space<vmem>>, vector<2x512xf32>
    %c0_26 = arith.constant 0 : index
    %c3072_27 = arith.constant 3072 : index
    %45 = vector.load %arg3[%c0_26, %c3072_27] : memref<1x4800xf32, #tpu.memory_space<vmem>>, vector<1x512xf32>
    %46 = vector.broadcast %45 : vector<1x512xf32> to vector<2x512xf32>
    %47 = arith.mulf %44, %46 : vector<2x512xf32>
    %cst_28 = arith.constant dense<0.000000e+00> : vector<2xf32>
    %48 = vector.multi_reduction <add>, %47, %cst_28 [1] : vector<2x512xf32> to vector<2xf32>
    %49 = vector.shape_cast %48 : vector<2xf32> to vector<2x1xf32>
    %50 = arith.addf %43, %49 : vector<2x1xf32>
    %c0_29 = arith.constant 0 : index
    %c3584 = arith.constant 3584 : index
    %51 = vector.load %arg2[%c0_29, %c3584] : memref<2x4800xf32, #tpu.memory_space<vmem>>, vector<2x512xf32>
    %c0_30 = arith.constant 0 : index
    %c3584_31 = arith.constant 3584 : index
    %52 = vector.load %arg3[%c0_30, %c3584_31] : memref<1x4800xf32, #tpu.memory_space<vmem>>, vector<1x512xf32>
    %53 = vector.broadcast %52 : vector<1x512xf32> to vector<2x512xf32>
    %54 = arith.mulf %51, %53 : vector<2x512xf32>
    %cst_32 = arith.constant dense<0.000000e+00> : vector<2xf32>
    %55 = vector.multi_reduction <add>, %54, %cst_32 [1] : vector<2x512xf32> to vector<2xf32>
    %56 = vector.shape_cast %55 : vector<2xf32> to vector<2x1xf32>
    %57 = arith.addf %50, %56 : vector<2x1xf32>
    %c0_33 = arith.constant 0 : index
    %c4096 = arith.constant 4096 : index
    %58 = vector.load %arg2[%c0_33, %c4096] : memref<2x4800xf32, #tpu.memory_space<vmem>>, vector<2x512xf32>
    %c0_34 = arith.constant 0 : index
    %c4096_35 = arith.constant 4096 : index
    %59 = vector.load %arg3[%c0_34, %c4096_35] : memref<1x4800xf32, #tpu.memory_space<vmem>>, vector<1x512xf32>
    %60 = vector.broadcast %59 : vector<1x512xf32> to vector<2x512xf32>
    %61 = arith.mulf %58, %60 : vector<2x512xf32>
    %cst_36 = arith.constant dense<0.000000e+00> : vector<2xf32>
    %62 = vector.multi_reduction <add>, %61, %cst_36 [1] : vector<2x512xf32> to vector<2xf32>
    %63 = vector.shape_cast %62 : vector<2xf32> to vector<2x1xf32>
    %64 = arith.addf %57, %63 : vector<2x1xf32>
    %c0_37 = arith.constant 0 : index
    %c4608 = arith.constant 4608 : index
    %65 = vector.load %arg2[%c0_37, %c4608] : memref<2x4800xf32, #tpu.memory_space<vmem>>, vector<2x192xf32>
    %c0_38 = arith.constant 0 : index
    %c4608_39 = arith.constant 4608 : index
    %66 = vector.load %arg3[%c0_38, %c4608_39] : memref<1x4800xf32, #tpu.memory_space<vmem>>, vector<1x192xf32>
    %67 = vector.broadcast %66 : vector<1x192xf32> to vector<2x192xf32>
    %68 = arith.mulf %65, %67 : vector<2x192xf32>
    %cst_40 = arith.constant dense<0.000000e+00> : vector<2xf32>
    %69 = vector.multi_reduction <add>, %68, %cst_40 [1] : vector<2x192xf32> to vector<2xf32>
    %70 = vector.shape_cast %69 : vector<2xf32> to vector<2x1xf32>
    %71 = arith.addf %64, %70 : vector<2x1xf32>
    %72 = vector.broadcast %0 : f32 to vector<2x1xf32>
    %73 = arith.addf %71, %72 : vector<2x1xf32>
    %c0_41 = arith.constant 0 : index
    %c0_42 = arith.constant 0 : index
    %74 = vector.load %arg4[%c0_41, %c0_42] : memref<2x1xf32, #tpu.memory_space<vmem>>, vector<2x1xf32>
    tpu.vector_store %arg4[%c0_41, %c0_42], %73 {strides = array<i32>} : memref<2x1xf32, #tpu.memory_space<vmem>>, vector<2x1xf32>,
    return
  }
  func.func @transform_0(%arg0: i32) -> i32 {
    %c0_i32 = arith.constant 0 : i32
    %c0_i32_0 = arith.constant 0 : i32
    return %c0_i32 : i32
  }
  func.func @transform_1(%arg0: i32) -> (i32, i32) {
    %c0_i32 = arith.constant 0 : i32
    %c0_i32_0 = arith.constant 0 : i32
    return %arg0, %c0_i32 : i32, i32
  }
  func.func @transform_2(%arg0: i32) -> (i32, i32) {
    %c0_i32 = arith.constant 0 : i32
    %c0_i32_0 = arith.constant 0 : i32
    %c0_i32_1 = arith.constant 0 : i32
    return %c0_i32, %c0_i32_0 : i32, i32
  }
  func.func @transform_3(%arg0: i32) -> (i32, i32) {
    %c0_i32 = arith.constant 0 : i32
    %c0_i32_0 = arith.constant 0 : i32
    return %arg0, %c0_i32 : i32, i32
  }
}

</mosaic_0001>

<bundles_post_ra>
// kernel: tpu_custom_call.1
= control target key start
LH: loop header
LB: loop body
LE: loop exit
PB: predicated region body
PF: predicated region fallthrough
CT: control target
= control target key end

     0   :  { %9 = vsyncpa [#allocation4], 0  ;;  %s947_s0 = inlined_call_operand.<no memory space> [shape: f32[1], index: 0, kind: input, shape index: {}]   ;;  %s948_s1 = inlined_call_operand.hbm [shape: f32[2,4800], index: 1, kind: input, shape index: {}]   ;;  %s949_s2 = inlined_call_operand.hbm [shape: f32[1,4800], index: 2, kind: input, shape index: {}]   ;;  %s950_s3 = inlined_call_operand.vmem [shape: f32[2,1], index: 3, kind: output, shape index: {}]  }
   0x1   :  { %10 = vsyncpa [#allocation6], 0  ;;  %s771_s12 = smov [#allocation3]   ;;  %s772_s14 = smov [#allocation5]  }
   0x2   :  { %s19_s13 = sshll.u32 %s771_s12, 4  ;;  %s29_s15 = sshll.u32 %s772_s14, 4  ;;  %s20_s13 = int_to_ptr.vmem [resolvable:$true] %s19_s13  ;;  %s30_s15 = int_to_ptr.vmem [resolvable:$true] %s29_s15 }
   0x3   :  { %s723_s18 = scalar_lea.hbm %s948_s1, 1216 }
   0x4   :  { %p724_p0 = scmp.ne.s32.totalorder %s948_s1, %s723_s18  ;;  %p727_p1 = scmp.lt.u32.totalorder %s723_s18, %s948_s1 }
   0x6   :  { %p729_p2 = pnand %p727_p1, %p724_p0 }
   0x8   :  { %732 = shalt.err (!%p729_p2)
}
   0x9   :  { %s733_s23 = scalar_lea.vmem %s20_s13, 1216  ;;  %p738_p4 = scmp.lt.s32.totalorder %s20_s13, %s20_s13 }
   0xa   :  { %p734_p3 = scmp.ne.s32.totalorder %s20_s13, %s733_s23  ;;  %p739_p5 = scmp.lt.s32.totalorder %s733_s23, %s733_s23 }
   0xc   :  { %p740_p6 = por %p739_p5, %p738_p4 }
   0xe   :  { %p741_p7 = pnand %p740_p6, %p734_p3 }
  0x10   :  { %744 = shalt.err (!%p741_p7)
}
  0x11   :  { %22 = dma.hbm_to_vmem [thread:$0]  %s948_s1, 1216, %s20_s13, [#allocation4]  }
  0x12   :  { %s745_s28 = scalar_lea.hbm %s949_s2, 608 }
  0x13   :  { %p746_p8 = scmp.ne.s32.totalorder %s949_s2, %s745_s28  ;;  %p749_p9 = scmp.lt.u32.totalorder %s745_s28, %s949_s2 }
  0x15   :  { %p751_p10 = pnand %p749_p9, %p746_p8 }
  0x17   :  { %754 = shalt.err (!%p751_p10)
}
  0x18   :  { %s755_s6 = scalar_lea.vmem %s30_s15, 608  ;;  %p760_p12 = scmp.lt.s32.totalorder %s30_s15, %s30_s15 }
  0x19   :  { %p756_p11 = scmp.ne.s32.totalorder %s30_s15, %s755_s6  ;;  %p761_p13 = scmp.lt.s32.totalorder %s755_s6, %s755_s6 }
  0x1b   :  { %p762_p0 = por %p761_p13, %p760_p12 }
  0x1d   :  { %p763_p1 = pnand %p762_p0, %p756_p11 }
  0x1f   :  { %766 = shalt.err (!%p763_p1)
}
  0x20   :  { %32 = dma.hbm_to_vmem [thread:$0]  %s949_s2, 608, %s30_s15, [#allocation6]  }
  0x21   :  { %767 = dma.done.wait [#allocation4], 1216  }
  0x22   :  { %768 = vsyncadd [#allocation4], 4294966080 }
  0x23   :  { %769 = dma.done.wait [#allocation6], 608  }
  0x24   :  { %770 = vsyncadd [#allocation6], 4294966688  ;;  %v43_v0 = vlaneseq  ;;  %v773_v1 = vmov 1983009808   ;;  %v41_v9 = vld [vmem:[#allocation5] sm:$0xf] }
  0x25   :  { %v62_v2 = vunpack.c.l.s4 %v773_v1  ;;  %v182_v15 = vld [vmem:[#allocation5 + $0x8] sm:$0xf]  ;;  %v112_v16 = vld [vmem:[#allocation5 + $0x4] sm:$0xf]  ;;  %vm100_vm0 = vcmask 1041408   ;;  %v40_v35 = vld [vmem:[#allocation3] sm:$0xff] }
  0x26   :  { %v44_v3 = vshrl.u32 %v43_v0, 7  ;;  %v252_v21 = vld [vmem:[#allocation5 + $0xc] sm:$0xf]  ;;  %v322_v34 = vld [vmem:[#allocation5 + $0x10] sm:$0xf]  ;;  %v181_v41 = vld [vmem:[#allocation3 + $0x10] sm:$0xff] }
  0x27   :  { %v63_v4 = vunpack.c.0.s8 %v62_v2  ;;  %v111_v50 = vld [vmem:[#allocation3 + $0x8] sm:$0xff]  ;;  %vm704_vm1 = vcmask 517120   ;;  %vm712_vm2 = vcmask 1024  }
  0x28   :  { %v818_v5 = vsub.s32 0, %v44_v3  ;;  %v820_v6 = vsub.s32 1, %v44_v3  ;;  %v822_v7 = vsub.s32 2, %v44_v3  ;;  %v824_v8 = vsub.s32 3, %v44_v3 }
  0x29   :  { %v826_v10 = vsub.s32 %v63_v4, %v44_v3 }
  0x2a   :  { %v46_v11 = vrot.slane %v41_v9, %v818_v5  ;;  %v50_v12 = vrot.slane %v41_v9, %v820_v6  ;;  %v54_v13 = vrot.slane %v41_v9, %v822_v7  ;;  %v58_v14 = vrot.slane %v41_v9, %v824_v8 }
  0x2b   :  { %v187_v17 = vrot.slane %v182_v15, %v818_v5  ;;  %v191_v18 = vrot.slane %v182_v15, %v820_v6  ;;  %v195_v19 = vrot.slane %v182_v15, %v822_v7  ;;  %v199_v20 = vrot.slane %v182_v15, %v824_v8 }
  0x2c   :  { %v59_v22 = vcombine.low %v46_v11, %v50_v12  ;;  %v60_v23 = vcombine.low %v54_v13, %v58_v14  ;;  %v117_v24 = vrot.slane %v112_v16, %v818_v5  ;;  %v121_v25 = vrot.slane %v112_v16, %v820_v6 }
  0x2d   :  { %v200_v26 = vcombine.low %v187_v17, %v191_v18  ;;  %v201_v27 = vcombine.low %v195_v19, %v199_v20  ;;  %v125_v28 = vrot.slane %v112_v16, %v822_v7  ;;  %v129_v29 = vrot.slane %v112_v16, %v824_v8  ;;  %v251_v19 = vld [vmem:[#allocation3 + $0x18] sm:$0xff] }
  0x2e   :  { %v67_v30 = vrot.slane %v59_v22, %v826_v10  ;;  %v74_v31 = vrot.slane %v60_v23, %v826_v10  ;;  %v130_v32 = vcombine.low %v117_v24, %v121_v25  ;;  %v257_v33 = vrot.slane %v252_v21, %v818_v5 }
  0x2f   :  { %v208_v36 = vrot.slane %v200_v26, %v826_v10  ;;  %v215_v37 = vrot.slane %v201_v27, %v826_v10  ;;  %v131_v38 = vcombine.low %v125_v28, %v129_v29  ;;  %v261_v39 = vrot.slane %v252_v21, %v820_v6 }
  0x30   :  { %v75_v40 = vcombine.low %v67_v30, %v74_v31  ;;  %v138_v42 = vrot.slane %v130_v32, %v826_v10  ;;  %v265_v43 = vrot.slane %v252_v21, %v822_v7  ;;  %v269_v44 = vrot.slane %v252_v21, %v824_v8 }
  0x31   :  { %v216_v45 = vcombine.low %v208_v36, %v215_v37  ;;  %v145_v46 = vrot.slane %v131_v38, %v826_v10  ;;  %v270_v47 = vcombine.low %v257_v33, %v261_v39  ;;  %v327_v48 = vrot.slane %v322_v34, %v818_v5 }
  0x32   :  { %v77_v49 = vmul.f32 %v75_v40, %v40_v35  ;;  %v271_v51 = vcombine.low %v265_v43, %v269_v44  ;;  %v331_v52 = vrot.slane %v322_v34, %v820_v6  ;;  %v335_v53 = vrot.slane %v322_v34, %v822_v7  ;;  %v392_v40 = vld [vmem:[#allocation5 + $0x14] sm:$0xf] }
  0x33   :  { %v218_v54 = vmul.f32 %v216_v45, %v181_v41  ;;  %v146_v55 = vcombine.low %v138_v42, %v145_v46  ;;  %v278_v56 = vrot.slane %v270_v47, %v826_v10  ;;  %v339_v57 = vrot.slane %v322_v34, %v824_v8 }
  0x34   :  { %v79_v58 = vcombine.high %v77_v49, %v77_v49  ;;  %v86_v59 = vrot.slane %v77_v49, %v826_v10  ;;  %v285_v60 = vrot.slane %v271_v51, %v826_v10  ;;  %v340_v61 = vcombine.low %v327_v48, %v331_v52  ;;  %v321_v49 = vld [vmem:[#allocation3 + $0x20] sm:$0xff] }
  0x35   :  { %v220_v62 = vcombine.high %v218_v54, %v218_v54  ;;  %v227_v63 = vrot.slane %v218_v54, %v826_v10  ;;  %v148_v0 = vmul.f32 %v146_v55, %v111_v50  ;;  %v341_v1 = vcombine.low %v335_v53, %v339_v57  ;;  %v462_v54 = vld [vmem:[#allocation5 + $0x18] sm:$0xf] }
  0x36   :  { %v93_v2 = vrot.slane %v79_v58, %v826_v10  ;;  %v94_v3 = vcombine.high %v86_v59, %v86_v59  ;;  %v101_v4 = vsel %vm100_vm0, %v86_v59, 0.0  ;;  %v286_v9 = vcombine.low %v278_v56, %v285_v60 }
  0x37   :  { %v234_v11 = vrot.slane %v220_v62, %v826_v10  ;;  %v235_v12 = vcombine.high %v227_v63, %v227_v63  ;;  %v241_v13 = vsel %vm100_vm0, %v227_v63, 0.0  ;;  %v150_v14 = vcombine.high %v148_v0, %v148_v0  ;;  %v532_v63 = vld [vmem:[#allocation5 + $0x1c] sm:$0xf] }
  0x38   :  { %v95_v15 = vcombine.high %v93_v2, %v93_v2  ;;  %v102_v16 = vsel %vm100_vm0, %v94_v3, 0.0  ;;  %v104_v17 = vsel %vm100_vm0, %v93_v2, 0.0  ;;  %v157_v18 = vrot.slane %v148_v0, %v826_v10 }
  0x39   :  { %v103_v20 = vadd.f32 %v102_v16, %v101_v4  ;;  %v236_v21 = vcombine.high %v234_v11, %v234_v11  ;;  %v242_v22 = vsel %vm100_vm0, %v235_v12, 0.0  ;;  %v244_v23 = vsel %vm100_vm0, %v234_v11, 0.0 }
  0x3a   :  { %v106_v24 = vsel %vm100_vm0, %v95_v15, 0.0  ;;  %v243_v25 = vadd.f32 %v242_v22, %v241_v13  ;;  %v164_v26 = vrot.slane %v150_v14, %v826_v10  ;;  %v165_v27 = vcombine.high %v157_v18, %v157_v18 }
  0x3b   :  { %v105_v28 = vadd.f32 %v104_v17, %v103_v20  ;;  %v246_v29 = vsel %vm100_vm0, %v236_v21, 0.0  ;;  %v171_v30 = vsel %vm100_vm0, %v157_v18, 0.0  ;;  %v288_v31 = vmul.f32 %v286_v9, %v251_v19 }
  0x3c   :  { %v245_v32 = vadd.f32 %v244_v23, %v243_v25  ;;  %v166_v33 = vcombine.high %v164_v26, %v164_v26  ;;  %v172_v34 = vsel %vm100_vm0, %v165_v27, 0.0  ;;  %v174_v35 = vsel %vm100_vm0, %v164_v26, 0.0  ;;  %v602_v25 = vld [vmem:[#allocation5 + $0x20] sm:$0xf] }
  0x3d   :  { %v107_v36 = vadd.f32 %v106_v24, %v105_v28  ;;  %v173_v37 = vadd.f32 %v172_v34, %v171_v30  ;;  %v290_v38 = vcombine.high %v288_v31, %v288_v31  ;;  %v297_v39 = vrot.slane %v288_v31, %v826_v10 }
  0x3e   :  { %v247_v41 = vadd.f32 %v246_v29, %v245_v32  ;;  %v176_v42 = vsel %vm100_vm0, %v166_v33, 0.0  ;;  %v348_v43 = vrot.slane %v340_v61, %v826_v10  ;;  %v355_v44 = vrot.slane %v341_v1, %v826_v10  ;;  %v391_v29 = vld [vmem:[#allocation3 + $0x28] sm:$0xff] }
  0x3f   :  { %108 = vadd.xlane.f32.xlu0 %v107_v36  ;;  %v175_v45 = vadd.f32 %v174_v35, %v173_v37  ;;  %v304_v46 = vrot.slane %v290_v38, %v826_v10  ;;  %v305_v47 = vcombine.high %v297_v39, %v297_v39  ;;  %v311_v48 = vsel %vm100_vm0, %v297_v39, 0.0  ;;  %v461_v36 = vld [vmem:[#allocation3 + $0x30] sm:$0xff] }
  0x40   :  { %248 = vadd.xlane.f32.xlu1 %v247_v41  ;;  %v356_v50 = vcombine.low %v348_v43, %v355_v44  ;;  %v397_v51 = vrot.slane %v392_v40, %v818_v5  ;;  %v401_v52 = vrot.slane %v392_v40, %v820_v6  ;;  %v405_v53 = vrot.slane %v392_v40, %v822_v7  ;;  %v672_v44 = vld [vmem:[#allocation5 + $0x24] sm:$0x3] }
  0x41   :  { %v177_v55 = vadd.f32 %v176_v42, %v175_v45  ;;  %v306_v56 = vcombine.high %v304_v46, %v304_v46  ;;  %v312_v57 = vsel %vm100_vm0, %v305_v47, 0.0  ;;  %v314_v58 = vsel %vm100_vm0, %v304_v46, 0.0 }
  0x42   :  { %v313_v59 = vadd.f32 %v312_v57, %v311_v48  ;;  %v358_v60 = vmul.f32 %v356_v50, %v321_v49  ;;  %v409_v61 = vrot.slane %v392_v40, %v824_v8  ;;  %v410_v62 = vcombine.low %v397_v51, %v401_v52 }
  0x43   :  { %178 = vadd.xlane.f32.xlu0 %v177_v55  ;;  %v316_v0 = vsel %vm100_vm0, %v306_v56, 0.0  ;;  %v467_v1 = vrot.slane %v462_v54, %v818_v5  ;;  %v471_v2 = vrot.slane %v462_v54, %v820_v6  ;;  %v475_v3 = vrot.slane %v462_v54, %v822_v7 }
  0x44   :  { %v315_v4 = vadd.f32 %v314_v58, %v313_v59  ;;  %v360_v9 = vcombine.high %v358_v60, %v358_v60  ;;  %v367_v11 = vrot.slane %v358_v60, %v826_v10  ;;  %v411_v12 = vcombine.low %v405_v53, %v409_v61  ;;  %v531_v59 = vld [vmem:[#allocation3 + $0x38] sm:$0xff] }
  0x45   :  { %v418_v13 = vrot.slane %v410_v62, %v826_v10  ;;  %v479_v14 = vrot.slane %v462_v54, %v824_v8  ;;  %v480_v15 = vcombine.low %v467_v1, %v471_v2  ;;  %v537_v16 = vrot.slane %v532_v63, %v818_v5 }
  0x46   :  { %v317_v17 = vadd.f32 %v316_v0, %v315_v4  ;;  %v374_v18 = vrot.slane %v360_v9, %v826_v10  ;;  %v375_v19 = vcombine.high %v367_v11, %v367_v11  ;;  %v381_v20 = vsel %vm100_vm0, %v367_v11, 0.0 }
  0x47   :  { %v425_v21 = vrot.slane %v411_v12, %v826_v10  ;;  %v481_v22 = vcombine.low %v475_v3, %v479_v14  ;;  %v488_v23 = vrot.slane %v480_v15, %v826_v10  ;;  %v541_v24 = vrot.slane %v532_v63, %v820_v6  ;;  %v601_v12 = vld [vmem:[#allocation3 + $0x40] sm:$0xff] }
  0x48   :  { %318 = vadd.xlane.f32.xlu1 %v317_v17  ;;  %v376_v26 = vcombine.high %v374_v18, %v374_v18  ;;  %v382_v27 = vsel %vm100_vm0, %v375_v19, 0.0  ;;  %v384_v28 = vsel %vm100_vm0, %v374_v18, 0.0  ;;  %v545_v30 = vrot.slane %v532_v63, %v822_v7 }
  0x49   :  { %v383_v31 = vadd.f32 %v382_v27, %v381_v20  ;;  %v426_v32 = vcombine.low %v418_v13, %v425_v21  ;;  %v495_v33 = vrot.slane %v481_v22, %v826_v10  ;;  %v549_v34 = vrot.slane %v532_v63, %v824_v8 }
  0x4a   :  { %v386_v35 = vsel %vm100_vm0, %v376_v26, 0.0  ;;  %v550_v37 = vcombine.low %v537_v16, %v541_v24  ;;  %v607_v38 = vrot.slane %v602_v25, %v818_v5  ;;  %v611_v39 = vrot.slane %v602_v25, %v820_v6 }
  0x4b   :  { %v385_v40 = vadd.f32 %v384_v28, %v383_v31  ;;  %v428_v41 = vmul.f32 %v426_v32, %v391_v29  ;;  %v496_v42 = vcombine.low %v488_v23, %v495_v33  ;;  %v551_v43 = vcombine.low %v545_v30, %v549_v34  ;;  %v671_v31 = vld [vmem:[#allocation3 + $0x48] sm:$0xf] }
  0x4c   :  { %v558_v45 = vrot.slane %v550_v37, %v826_v10  ;;  %v615_v46 = vrot.slane %v602_v25, %v822_v7  ;;  %v619_v47 = vrot.slane %v602_v25, %v824_v8  ;;  %v620_v48 = vcombine.low %v607_v38, %v611_v39 }
  0x4d   :  { %v387_v49 = vadd.f32 %v386_v35, %v385_v40  ;;  %v430_v50 = vcombine.high %v428_v41, %v428_v41  ;;  %v437_v51 = vrot.slane %v428_v41, %v826_v10  ;;  %v498_v52 = vmul.f32 %v496_v42, %v461_v36 }
  0x4e   :  { %v565_v53 = vrot.slane %v551_v43, %v826_v10  ;;  %v621_v54 = vcombine.low %v615_v46, %v619_v47  ;;  %v628_v55 = vrot.slane %v620_v48, %v826_v10  ;;  %v677_v56 = vrot.slane %v672_v44, %v818_v5 }
  0x4f   :  { %388 = vadd.xlane.f32.xlu0 %v387_v49  ;;  %v444_v57 = vrot.slane %v430_v50, %v826_v10  ;;  %v445_v58 = vcombine.high %v437_v51, %v437_v51  ;;  %v451_v7 = vsel %vm100_vm0, %v437_v51, 0.0  ;;  %v500_v8 = vcombine.high %v498_v52, %v498_v52 }
  0x50   :  { %v507_v60 = vrot.slane %v498_v52, %v826_v10  ;;  %v566_v61 = vcombine.low %v558_v45, %v565_v53  ;;  %v635_v62 = vrot.slane %v621_v54, %v826_v10  ;;  %v681_v63 = vrot.slane %v672_v44, %v820_v6 }
  0x51   :  { %v446_v0 = vcombine.high %v444_v57, %v444_v57  ;;  %v452_v1 = vsel %vm100_vm0, %v445_v58, 0.0  ;;  %v454_v5 = vsel %vm100_vm0, %v444_v57, 0.0  ;;  %v514_v2 = vrot.slane %v500_v8, %v826_v10 }
  0x52   :  { %v453_v3 = vadd.f32 %v452_v1, %v451_v7  ;;  %v515_v4 = vcombine.high %v507_v60, %v507_v60  ;;  %v521_v9 = vsel %vm100_vm0, %v507_v60, 0.0  ;;  %v568_v11 = vmul.f32 %v566_v61, %v531_v59 }
  0x53   :  { %v456_v13 = vsel %vm100_vm0, %v446_v0, 0.0  ;;  %v516_v14 = vcombine.high %v514_v2, %v514_v2  ;;  %v524_v15 = vsel %vm100_vm0, %v514_v2, 0.0  ;;  %v636_v16 = vcombine.low %v628_v55, %v635_v62 }
  0x54   :  { %v455_v6 = vadd.f32 %v454_v5, %v453_v3  ;;  %v522_v17 = vsel %vm100_vm0, %v515_v4, 0.0  ;;  %v570_v18 = vcombine.high %v568_v11, %v568_v11  ;;  %v577_v19 = vrot.slane %v568_v11, %v826_v10 }
  0x55   :  { %v523_v20 = vadd.f32 %v522_v17, %v521_v9  ;;  %v526_v21 = vsel %vm100_vm0, %v516_v14, 0.0  ;;  %v638_v22 = vmul.f32 %v636_v16, %v601_v12  ;;  %v682_v23 = vcombine.low %v677_v56, %v681_v63 }
  0x56   :  { %v457_v24 = vadd.f32 %v456_v13, %v455_v6  ;;  %v584_v25 = vrot.slane %v570_v18, %v826_v10  ;;  %v585_v26 = vcombine.high %v577_v19, %v577_v19  ;;  %v591_v27 = vsel %vm100_vm0, %v577_v19, 0.0 }
  0x57   :  { %v525_v28 = vadd.f32 %v524_v15, %v523_v20  ;;  %v640_v29 = vcombine.high %v638_v22, %v638_v22  ;;  %v647_v30 = vrot.slane %v638_v22, %v826_v10  ;;  %v689_v32 = vrot.slane %v682_v23, %v826_v10 }
  0x58   :  { %458 = vadd.xlane.f32.xlu1 %v457_v24  ;;  %v586_v33 = vcombine.high %v584_v25, %v584_v25  ;;  %v592_v34 = vsel %vm100_vm0, %v585_v26, 0.0  ;;  %v594_v35 = vsel %vm100_vm0, %v584_v25, 0.0  ;;  %v710_v12 = vstv %s947_s0 }
  0x59   :  { %v527_v36 = vadd.f32 %v526_v21, %v525_v28  ;;  %v593_v37 = vadd.f32 %v592_v34, %v591_v27  ;;  %v654_v38 = vrot.slane %v640_v29, %v826_v10  ;;  %v655_v39 = vcombine.high %v647_v30, %v647_v30 }
  0x5a   :  { %v596_v40 = vsel %vm100_vm0, %v586_v33, 0.0  ;;  %v661_v41 = vsel %vm100_vm0, %v647_v30, 0.0  ;;  %v691_v42 = vmul.f32 %v689_v32, %v671_v31 }
  0x5b   :  { %528 = vadd.xlane.f32.xlu0 %v527_v36  ;;  %v595_v43 = vadd.f32 %v594_v35, %v593_v37  ;;  %v656_v44 = vcombine.high %v654_v38, %v654_v38  ;;  %v662_v45 = vsel %vm100_vm0, %v655_v39, 0.0  ;;  %v664_v46 = vsel %vm100_vm0, %v654_v38, 0.0 }
  0x5c   :  { %v663_v47 = vadd.f32 %v662_v45, %v661_v41  ;;  %v699_v48 = vrot.slane %v691_v42, %v826_v10 }
  0x5d   :  { %v597_v49 = vadd.f32 %v596_v40, %v595_v43  ;;  %v666_v50 = vsel %vm100_vm0, %v656_v44, 0.0 }
  0x5e   :  { %v665_v51 = vadd.f32 %v664_v46, %v663_v47  ;;  %v700_v52 = vcombine.high %v699_v48, %v699_v48  ;;  %v703_v53 = vsel %vm100_vm0, %v699_v48, 0.0 }
  0x5f   :  { %598 = vadd.xlane.f32.xlu1 %v597_v49 }
  0x60   :  { %v667_v54 = vadd.f32 %v666_v50, %v665_v51  ;;  %v705_v55 = vsel %vm704_vm1, %v700_v52, 0.0 }
  0x61   :  { %v706_v56 = vadd.f32 %v705_v55, %v703_v53 }
  0x62   :  { %668 = vadd.xlane.f32.xlu0 %v667_v54 }
  0x63   :  { %707 = vadd.xlane.f32.xlu1 %v706_v56 }
  0xcc   :  { %v109_v57 = vpop.xlane.xlu0 %108 }
  0xcd   :  { %v249_v7 = vpop.xlane.xlu1 %248 }
  0xd0   :  { %v179_v58 = vpop.xlane.xlu0 %178 }
  0xd1   :  { %v180_v8 = vadd.f32 %v179_v58, %v109_v57 }
  0xd3   :  { %v250_v59 = vadd.f32 %v249_v7, %v180_v8 }
  0xd5   :  { %v319_v10 = vpop.xlane.xlu1 %318 }
  0xd6   :  { %v320_v60 = vadd.f32 %v319_v10, %v250_v59 }
  0xdc   :  { %v389_v61 = vpop.xlane.xlu0 %388 }
  0xdd   :  { %v390_v62 = vadd.f32 %v389_v61, %v320_v60 }
  0xe5   :  { %v459_v63 = vpop.xlane.xlu1 %458 }
  0xe6   :  { %v460_v0 = vadd.f32 %v459_v63, %v390_v62 }
  0xe8   :  { %v529_v1 = vpop.xlane.xlu0 %528 }
  0xe9   :  { %v530_v5 = vadd.f32 %v529_v1, %v460_v0 }
  0xec   :  { %v599_v2 = vpop.xlane.xlu1 %598 }
  0xed   :  { %v600_v3 = vadd.f32 %v599_v2, %v530_v5 }
  0xef   :  { %v669_v4 = vpop.xlane.xlu0 %668 }
  0xf0   :  { %v670_v9 = vadd.f32 %v669_v4, %v600_v3  ;;  %v708_v11 = vpop.xlane.xlu1 %707 }
  0xf2   :  { %v709_v13 = vadd.f32 %v708_v11, %v670_v9 }
  0xf4   :  { %v711_v14 = vadd.f32 %v710_v12, %v709_v13 }
  0xf6   :  { %713 = vst.msk [vmem:[%s950_s3] sm:$0x3] %vm712_vm2, %v711_v14 }
  0xf7   :  { %718 = vsyncpa [#allocation4], 1 }
  0xf8   :  { %719 = vsyncpa [#allocation6], 1 }

</bundles_post_ra>
